<compile_context>
chip_gen: v7x
topology: tpu7x:2x2x1
jax: 0.10.0
libtpu: 0.0.40
codegen_flags: <defaults>
</compile_context>

<pallas_src>
import functools

import jax
import jax.numpy as jnp
from jax.experimental import pallas as pl
from jax.experimental.pallas import tpu as pltpu

_EPS = 1e-5
_PAD = 128  # lane-aligned halo for the flattened-spatial shift trick (needs W+1 <= _PAD)


# ----------------------------- kernel body ---------------------------------


def _conv3x3_flat(feat, w_all, bias, masks, W):
    """3x3 'same' conv on channel-major, flattened-spatial activations.

    feat:  (Cin, H*W) f32, each row is one channel image flattened row-major.
    w_all: (9, Cout, Cin) f32; w_all[dy*3+dx, co, ci] = w_hwio[dy, dx, ci, co].
    bias:  (Cout, 1) f32.
    masks: (mask_left, mask_right) -- (1, H*W) bool masks for dx==0 / dx==2 taps.
    """
    cin, HW = feat.shape
    cout = w_all.shape[1]
    mask_l, mask_r = masks

    # Pad the flattened image once with a lane-aligned zero halo; every tap is
    # then a cheap static lane-shifted slice of this value (no VMEM copies).
    zpad = jnp.zeros((cin, _PAD), jnp.float32)
    fpad = jnp.concatenate([zpad, feat, zpad], axis=1)  # (cin, HW + 2*_PAD)

    acc = jnp.zeros((cout, HW), jnp.float32)
    for dy in range(3):
        for dx in range(3):
            off = (dy - 1) * W + (dx - 1)
            tap = fpad[:, _PAD + off:_PAD + off + HW]   # (cin, HW)
            if dx == 0:                                  # x-1 invalid at col 0
                tap = jnp.where(mask_l, tap, 0.0)
            elif dx == 2:                                # x+1 invalid at col W-1
                tap = jnp.where(mask_r, tap, 0.0)
            # (cout, cin) @ (cin, HW): lane-dense (N = H*W) MXU matmul.
            acc = acc + jnp.dot(w_all[dy * 3 + dx], tap,
                                preferred_element_type=jnp.float32)
    return acc + bias  # (cout, HW)


def _adain(feat, sigma, mu):
    """feat: (C, HW) f32; sigma, mu: (C, 1) f32.  Instance-norm statistics."""
    mean = jnp.mean(feat, axis=1, keepdims=True)
    var = jnp.mean((feat - mean) ** 2, axis=1, keepdims=True)
    return sigma * ((feat - mean) * jax.lax.rsqrt(var + _EPS)) + mu


def _residual_block_kernel(x_ref, w1_ref, b1_ref, w2_ref, b2_ref,
                           s1_ref, m1_ref, s2_ref, m2_ref, out_ref, *, H, W):
    HW = H * W
    x = x_ref[0].astype(jnp.float32)                    # (C, HW), lane-dense

    # Column masks for the horizontal taps (computed once, reused by both convs).
    col = jax.lax.broadcasted_iota(jnp.int32, (1, HW), 1) % W
    masks = (col >= 1, col <= W - 2)

    w1 = w1_ref[...].astype(jnp.float32)                # (9, C, C)
    w2 = w2_ref[...].astype(jnp.float32)                # (9, Cout, C)
    b1 = b1_ref[...].astype(jnp.float32)                # (C, 1)
    b2 = b2_ref[...].astype(jnp.float32)                # (Cout, 1)

    # right = conv_r1(x); right = AdaIN(right, sigma_1, mu_1); right = relu(right)
    r = _conv3x3_flat(x, w1, b1, masks, W)
    r = _adain(r, s1_ref[0].astype(jnp.float32), m1_ref[0].astype(jnp.float32))
    r = jnp.maximum(r, 0.0)

    # right = conv_r2(right); right = AdaIN(right, sigma_2, mu_2)
    r = _conv3x3_flat(r, w2, b2, masks, W)
    r = _adain(r, s2_ref[0].astype(jnp.float32), m2_ref[0].astype(jnp.float32))

    # output = left + right   (lane-dense (1, C, H*W) store)
    out_ref[0] = (x + r).astype(out_ref.dtype)


# ----------------------------- JAX wrapper ----------------------------------


def residual_block_adain(x_nchw, w1, b1, w2, b2, sigma1, mu1, sigma2, mu2):
    """x_nchw: (N, C, H, W); w*: (3, 3, Cin, Cout) HWIO; b*: (Cout,);
    sigma*/mu*: (N, C_of_that_stage).  Returns (N, C, H, W)."""
    N, C, H, W = x_nchw.shape
    Cout = w2.shape[-1]
    assert C == Cout, "residual add requires in_channel == out_channel"
    assert W + 1 <= _PAD, "increase _PAD for very wide images"
    HW = H * W

    # Free reshapes only: no transpose, no HBM padding of the activation.
    x_flat = x_nchw.reshape(N, C, HW)
    # Tiny weight re-layouts (144 floats): (3,3,Cin,Cout) -> (9, Cout, Cin).
    w1k = jnp.transpose(w1, (0, 1, 3, 2)).reshape(9, C, C)
    w2k = jnp.transpose(w2, (0, 1, 3, 2)).reshape(9, Cout, C)
    b1k = b1.reshape(C, 1)
    b2k = b2.reshape(Cout, 1)
    s1 = sigma1.reshape(N, C, 1)
    m1 = mu1.reshape(N, C, 1)
    s2 = sigma2.reshape(N, Cout, 1)
    m2 = mu2.reshape(N, Cout, 1)

    grid_spec = pltpu.PrefetchScalarGridSpec(
        num_scalar_prefetch=0,
        grid=(N,),
        in_specs=[
            pl.BlockSpec((1, C, HW), lambda n: (n, 0, 0)),       # x
            pl.BlockSpec((9, C, C), lambda n: (0, 0, 0)),        # w1
            pl.BlockSpec((C, 1), lambda n: (0, 0)),              # b1
            pl.BlockSpec((9, Cout, C), lambda n: (0, 0, 0)),     # w2
            pl.BlockSpec((Cout, 1), lambda n: (0, 0)),           # b2
            pl.BlockSpec((1, C, 1), lambda n: (n, 0, 0)),        # sigma1
            pl.BlockSpec((1, C, 1), lambda n: (n, 0, 0)),        # mu1
            pl.BlockSpec((1, Cout, 1), lambda n: (n, 0, 0)),     # sigma2
            pl.BlockSpec((1, Cout, 1), lambda n: (n, 0, 0)),     # mu2
        ],
        out_specs=pl.BlockSpec((1, Cout, HW), lambda n: (n, 0, 0)),
    )

    out_flat = pl.pallas_call(
        functools.partial(_residual_block_kernel, H=H, W=W),
        out_shape=jax.ShapeDtypeStruct((N, Cout, HW), x_nchw.dtype),
        grid_spec=grid_spec,
        compiler_params=pltpu.CompilerParams(
            dimension_semantics=("parallel",)),
    )(x_flat, w1k, b1k, w2k, b2k, s1, m1, s2, m2)

    return out_flat.reshape(N, Cout, H, W)


# ------------------------ params / reference / main --------------------------


def spectral_normalize(w, n_iter=30):
    """Divide HWIO weight by largest singular value of its (Cout, Cin*k*k) view."""
    # TODO(synk): exact get_conv_layer/spectral_norm semantics were not provided;
    # power-iteration normalization applied at parameter-setup time in plain JAX.
    cout = w.shape[-1]
    mat = jnp.transpose(w, (3, 0, 1, 2)).reshape(cout, -1)
    v = jnp.ones((mat.shape[1],), w.dtype)
    for _ in range(n_iter):
        u = mat @ v
        u = u / (jnp.linalg.norm(u) + 1e-12)
        v = mat.T @ u
        v = v / (jnp.linalg.norm(v) + 1e-12)
    sigma = u @ (mat @ v)
    return w / sigma


def reference(x, w1, b1, w2, b2, s1, m1, s2, m2):
    """Pure-JAX reference of the PyTorch forward (NCHW)."""
    def conv(xx, w, b):
        y = jax.lax.conv_general_dilated(
            xx, w, window_strides=(1, 1), padding="SAME",
            dimension_numbers=("NCHW", "HWIO", "NCHW"))
        return y + b[None, :, None, None]

    def adain(f, s, m):
        mean = f.mean(axis=(2, 3), keepdims=True)
        var = ((f - mean) ** 2).mean(axis=(2, 3), keepdims=True)
        normed = (f - mean) * jax.lax.rsqrt(var + _EPS)
        return s[:, :, None, None] * normed + m[:, :, None, None]

    r = conv(x, w1, b1)
    r = adain(r, s1, m1)
    r = jnp.maximum(r, 0.0)
    r = conv(r, w2, b2)
    r = adain(r, s2, m2)
    return x + r


if __name__ == "__main__":
    N, C, H, W = 2, 4, 16, 16
    Cout = C  # residual add forces in_channel == out_channel

    key = jax.random.PRNGKey(0)
    ks = jax.random.split(key, 9)
    x = jax.random.normal(ks[0], (N, C, H, W), jnp.float32)

    w1 = spectral_normalize(0.2 * jax.random.normal(ks[1], (3, 3, C, C), jnp.float32))
    b1 = 0.1 * jax.random.normal(ks[2], (C,), jnp.float32)
    w2 = spectral_normalize(0.2 * jax.random.normal(ks[3], (3, 3, C, Cout), jnp.float32))
    b2 = 0.1 * jax.random.normal(ks[4], (Cout,), jnp.float32)

    sigma1 = 1.0 + 0.5 * jax.random.normal(ks[5], (N, C), jnp.float32)
    mu1 = 0.5 * jax.random.normal(ks[6], (N, C), jnp.float32)
    sigma2 = 1.0 + 0.5 * jax.random.normal(ks[7], (N, Cout), jnp.float32)
    mu2 = 0.5 * jax.random.normal(ks[8], (N, Cout), jnp.float32)

    out = residual_block_adain(x, w1, b1, w2, b2, sigma1, mu1, sigma2, mu2)
    out = jax.block_until_ready(out)

    ref = jax.block_until_ready(
        reference(x, w1, b1, w2, b2, sigma1, mu1, sigma2, mu2))

    assert out.shape == (N, C, H, W) and out.dtype == x.dtype
    assert jnp.allclose(out, ref, rtol=1e-4, atol=1e-4), (
        f"max abs err {jnp.max(jnp.abs(out - ref))}")

    print("KERNEL_OK")
</pallas_src>

<mosaic_0001>
module attributes {stable_mosaic.version = 11 : i64} {
  func.func @_residual_block_kernel(%arg0: i32, %arg1: memref<1x4x256xf32, #tpu.memory_space<vmem>>, %arg2: memref<9x4x4xf32, #tpu.memory_space<vmem>>, %arg3: memref<4x1xf32, #tpu.memory_space<vmem>>, %arg4: memref<9x4x4xf32, #tpu.memory_space<vmem>>, %arg5: memref<4x1xf32, #tpu.memory_space<vmem>>, %arg6: memref<1x4x1xf32, #tpu.memory_space<vmem>>, %arg7: memref<1x4x1xf32, #tpu.memory_space<vmem>>, %arg8: memref<1x4x1xf32, #tpu.memory_space<vmem>>, %arg9: memref<1x4x1xf32, #tpu.memory_space<vmem>>, %arg10: memref<1x4x256xf32, #tpu.memory_space<vmem>>) attributes {dimension_semantics = [#tpu.dimension_semantics<parallel>], iteration_bounds = array<i64: 2>, scalar_prefetch = 0 : i64, scratch_operands = 0 : i64, tpu.core_type = #tpu.core_type<tc>, window_params = [{transform_indices = @transform_0, window_bounds = array<i64: 1, 4, 256>}, {pipeline_mode = #tpu.pipeline_mode<synchronous>, transform_indices = @transform_1, window_bounds = array<i64: 9, 4, 4>}, {pipeline_mode = #tpu.pipeline_mode<synchronous>, transform_indices = @transform_2, window_bounds = array<i64: 4, 1>}, {pipeline_mode = #tpu.pipeline_mode<synchronous>, transform_indices = @transform_3, window_bounds = array<i64: 9, 4, 4>}, {pipeline_mode = #tpu.pipeline_mode<synchronous>, transform_indices = @transform_4, window_bounds = array<i64: 4, 1>}, {transform_indices = @transform_5, window_bounds = array<i64: 1, 4, 1>}, {transform_indices = @transform_6, window_bounds = array<i64: 1, 4, 1>}, {transform_indices = @transform_7, window_bounds = array<i64: 1, 4, 1>}, {transform_indices = @transform_8, window_bounds = array<i64: 1, 4, 1>}, {transform_indices = @transform_9, window_bounds = array<i64: 1, 4, 256>}]} {
    %c0 = arith.constant 0 : index
    %c0_0 = arith.constant 0 : index
    %c0_1 = arith.constant 0 : index
    %0 = vector.load %arg1[%c0, %c0_0, %c0_1] : memref<1x4x256xf32, #tpu.memory_space<vmem>>, vector<1x4x256xf32>
    %1 = vector.shape_cast %0 : vector<1x4x256xf32> to vector<4x256xf32>
    %2 = tpu.iota {dimensions = array<i32: 1>} : vector<1x256xi32>
    %c16_i32 = arith.constant 16 : i32
    %c0_i32 = arith.constant 0 : i32
    %3 = arith.cmpi eq, %c16_i32, %c0_i32 : i32
    %c1_i32 = arith.constant 1 : i32
    %4 = arith.select %3, %c1_i32, %c16_i32 : i32
    %5 = vector.broadcast %4 : i32 to vector<1x256xi32>
    %6 = arith.remsi %2, %5 : vector<1x256xi32>
    %c0_i32_2 = arith.constant 0 : i32
    %7 = vector.broadcast %c0_i32_2 : i32 to vector<1x256xi32>
    %8 = arith.cmpi ne, %6, %7 : vector<1x256xi32>
    %c0_i32_3 = arith.constant 0 : i32
    %9 = vector.broadcast %c0_i32_3 : i32 to vector<1x256xi32>
    %10 = arith.cmpi slt, %6, %9 : vector<1x256xi32>
    %c0_i32_4 = arith.constant 0 : i32
    %11 = arith.cmpi slt, %4, %c0_i32_4 : i32
    %12 = vector.broadcast %11 : i1 to vector<1x256xi1>
    %13 = vector.broadcast %12 : vector<1x256xi1> to vector<1x256xi1>
    %14 = arith.xori %10, %13 : vector<1x256xi1>
    %15 = arith.andi %14, %8 : vector<1x256xi1>
    %16 = vector.broadcast %4 : i32 to vector<1x256xi32>
    %17 = arith.addi %6, %16 : vector<1x256xi32>
    %18 = arith.select %15, %17, %6 : vector<1x256xi1>, vector<1x256xi32>
    %c1_i32_5 = arith.constant 1 : i32
    %19 = vector.broadcast %c1_i32_5 : i32 to vector<1x256xi32>
    %20 = arith.cmpi sge, %18, %19 : vector<1x256xi32>
    %c14_i32 = arith.constant 14 : i32
    %21 = vector.broadcast %c14_i32 : i32 to vector<1x256xi32>
    %22 = arith.cmpi sle, %18, %21 : vector<1x256xi32>
    %c0_6 = arith.constant 0 : index
    %c0_7 = arith.constant 0 : index
    %c0_8 = arith.constant 0 : index
    %23 = vector.load %arg2[%c0_6, %c0_7, %c0_8] : memref<9x4x4xf32, #tpu.memory_space<vmem>>, vector<9x4x4xf32>
    %c0_9 = arith.constant 0 : index
    %c0_10 = arith.constant 0 : index
    %c0_11 = arith.constant 0 : index
    %24 = vector.load %arg4[%c0_9, %c0_10, %c0_11] : memref<9x4x4xf32, #tpu.memory_space<vmem>>, vector<9x4x4xf32>
    %c0_12 = arith.constant 0 : index
    %c0_13 = arith.constant 0 : index
    %25 = vector.load %arg3[%c0_12, %c0_13] : memref<4x1xf32, #tpu.memory_space<vmem>>, vector<4x1xf32>
    %c0_14 = arith.constant 0 : index
    %c0_15 = arith.constant 0 : index
    %26 = vector.load %arg5[%c0_14, %c0_15] : memref<4x1xf32, #tpu.memory_space<vmem>>, vector<4x1xf32>
    %cst = arith.constant 0.000000e+00 : f32
    %27 = vector.broadcast %cst : f32 to vector<4x128xf32>
    %28 = tpu.concatenate %27, %1, %27 in 1 : vector<4x128xf32>, vector<4x256xf32>, vector<4x128xf32> -> vector<4x512xf32>
    %cst_16 = arith.constant 0.000000e+00 : f32
    %29 = vector.broadcast %cst_16 : f32 to vector<4x256xf32>
    %30 = vector.extract_strided_slice %28 {offsets = [0, 111], sizes = [4, 256], strides = [1, 1]} : vector<4x512xf32> to vector<4x256xf32>
    %cst_17 = arith.constant 0.000000e+00 : f32
    %31 = vector.shape_cast %20 : vector<1x256xi1> to vector<1x256xi1>
    %32 = vector.broadcast %31 : vector<1x256xi1> to vector<4x256xi1>
    %33 = vector.broadcast %cst_17 : f32 to vector<4x256xf32>
    %34 = arith.select %32, %30, %33 : vector<4x256xi1>, vector<4x256xf32>
    %35 = vector.extract_strided_slice %23 {offsets = [0, 0, 0], sizes = [1, 4, 4], strides = [1, 1, 1]} : vector<9x4x4xf32> to vector<1x4x4xf32>
    %36 = vector.shape_cast %35 : vector<1x4x4xf32> to vector<4x4xf32>
    %cst_18 = arith.constant dense<0.000000e+00> : vector<4x256xf32>
    %37 = tpu.matmul %36, %34, %cst_18 {dimension_numbers = #tpu.dot_dimension_numbers<[1], [0], [0], [1], [0, 0, 1, 1], [], []>} : vector<4x4xf32>, vector<4x256xf32>, vector<4x256xf32> -> vector<4x256xf32>
    %38 = arith.addf %29, %37 : vector<4x256xf32>
    %39 = vector.extract_strided_slice %28 {offsets = [0, 112], sizes = [4, 256], strides = [1, 1]} : vector<4x512xf32> to vector<4x256xf32>
    %40 = vector.extract_strided_slice %23 {offsets = [1, 0, 0], sizes = [1, 4, 4], strides = [1, 1, 1]} : vector<9x4x4xf32> to vector<1x4x4xf32>
    %41 = vector.shape_cast %40 : vector<1x4x4xf32> to vector<4x4xf32>
    %cst_19 = arith.constant dense<0.000000e+00> : vector<4x256xf32>
    %42 = tpu.matmul %41, %39, %cst_19 {dimension_numbers = #tpu.dot_dimension_numbers<[1], [0], [0], [1], [0, 0, 1, 1], [], []>} : vector<4x4xf32>, vector<4x256xf32>, vector<4x256xf32> -> vector<4x256xf32>
    %43 = arith.addf %38, %42 : vector<4x256xf32>
    %44 = vector.extract_strided_slice %28 {offsets = [0, 113], sizes = [4, 256], strides = [1, 1]} : vector<4x512xf32> to vector<4x256xf32>
    %cst_20 = arith.constant 0.000000e+00 : f32
    %45 = vector.shape_cast %22 : vector<1x256xi1> to vector<1x256xi1>
    %46 = vector.broadcast %45 : vector<1x256xi1> to vector<4x256xi1>
    %47 = vector.broadcast %cst_20 : f32 to vector<4x256xf32>
    %48 = arith.select %46, %44, %47 : vector<4x256xi1>, vector<4x256xf32>
    %49 = vector.extract_strided_slice %23 {offsets = [2, 0, 0], sizes = [1, 4, 4], strides = [1, 1, 1]} : vector<9x4x4xf32> to vector<1x4x4xf32>
    %50 = vector.shape_cast %49 : vector<1x4x4xf32> to vector<4x4xf32>
    %cst_21 = arith.constant dense<0.000000e+00> : vector<4x256xf32>
    %51 = tpu.matmul %50, %48, %cst_21 {dimension_numbers = #tpu.dot_dimension_numbers<[1], [0], [0], [1], [0, 0, 1, 1], [], []>} : vector<4x4xf32>, vector<4x256xf32>, vector<4x256xf32> -> vector<4x256xf32>
    %52 = arith.addf %43, %51 : vector<4x256xf32>
    %53 = vector.extract_strided_slice %28 {offsets = [0, 127], sizes = [4, 256], strides = [1, 1]} : vector<4x512xf32> to vector<4x256xf32>
    %cst_22 = arith.constant 0.000000e+00 : f32
    %54 = vector.shape_cast %20 : vector<1x256xi1> to vector<1x256xi1>
    %55 = vector.broadcast %54 : vector<1x256xi1> to vector<4x256xi1>
    %56 = vector.broadcast %cst_22 : f32 to vector<4x256xf32>
    %57 = arith.select %55, %53, %56 : vector<4x256xi1>, vector<4x256xf32>
    %58 = vector.extract_strided_slice %23 {offsets = [3, 0, 0], sizes = [1, 4, 4], strides = [1, 1, 1]} : vector<9x4x4xf32> to vector<1x4x4xf32>
    %59 = vector.shape_cast %58 : vector<1x4x4xf32> to vector<4x4xf32>
    %cst_23 = arith.constant dense<0.000000e+00> : vector<4x256xf32>
    %60 = tpu.matmul %59, %57, %cst_23 {dimension_numbers = #tpu.dot_dimension_numbers<[1], [0], [0], [1], [0, 0, 1, 1], [], []>} : vector<4x4xf32>, vector<4x256xf32>, vector<4x256xf32> -> vector<4x256xf32>
    %61 = arith.addf %52, %60 : vector<4x256xf32>
    %62 = vector.extract_strided_slice %28 {offsets = [0, 128], sizes = [4, 256], strides = [1, 1]} : vector<4x512xf32> to vector<4x256xf32>
    %63 = vector.extract_strided_slice %23 {offsets = [4, 0, 0], sizes = [1, 4, 4], strides = [1, 1, 1]} : vector<9x4x4xf32> to vector<1x4x4xf32>
    %64 = vector.shape_cast %63 : vector<1x4x4xf32> to vector<4x4xf32>
    %cst_24 = arith.constant dense<0.000000e+00> : vector<4x256xf32>
    %65 = tpu.matmul %64, %62, %cst_24 {dimension_numbers = #tpu.dot_dimension_numbers<[1], [0], [0], [1], [0, 0, 1, 1], [], []>} : vector<4x4xf32>, vector<4x256xf32>, vector<4x256xf32> -> vector<4x256xf32>
    %66 = arith.addf %61, %65 : vector<4x256xf32>
    %67 = vector.extract_strided_slice %28 {offsets = [0, 129], sizes = [4, 256], strides = [1, 1]} : vector<4x512xf32> to vector<4x256xf32>
    %cst_25 = arith.constant 0.000000e+00 : f32
    %68 = vector.shape_cast %22 : vector<1x256xi1> to vector<1x256xi1>
    %69 = vector.broadcast %68 : vector<1x256xi1> to vector<4x256xi1>
    %70 = vector.broadcast %cst_25 : f32 to vector<4x256xf32>
    %71 = arith.select %69, %67, %70 : vector<4x256xi1>, vector<4x256xf32>
    %72 = vector.extract_strided_slice %23 {offsets = [5, 0, 0], sizes = [1, 4, 4], strides = [1, 1, 1]} : vector<9x4x4xf32> to vector<1x4x4xf32>
    %73 = vector.shape_cast %72 : vector<1x4x4xf32> to vector<4x4xf32>
    %cst_26 = arith.constant dense<0.000000e+00> : vector<4x256xf32>
    %74 = tpu.matmul %73, %71, %cst_26 {dimension_numbers = #tpu.dot_dimension_numbers<[1], [0], [0], [1], [0, 0, 1, 1], [], []>} : vector<4x4xf32>, vector<4x256xf32>, vector<4x256xf32> -> vector<4x256xf32>
    %75 = arith.addf %66, %74 : vector<4x256xf32>
    %76 = vector.extract_strided_slice %28 {offsets = [0, 143], sizes = [4, 256], strides = [1, 1]} : vector<4x512xf32> to vector<4x256xf32>
    %cst_27 = arith.constant 0.000000e+00 : f32
    %77 = vector.shape_cast %20 : vector<1x256xi1> to vector<1x256xi1>
    %78 = vector.broadcast %77 : vector<1x256xi1> to vector<4x256xi1>
    %79 = vector.broadcast %cst_27 : f32 to vector<4x256xf32>
    %80 = arith.select %78, %76, %79 : vector<4x256xi1>, vector<4x256xf32>
    %81 = vector.extract_strided_slice %23 {offsets = [6, 0, 0], sizes = [1, 4, 4], strides = [1, 1, 1]} : vector<9x4x4xf32> to vector<1x4x4xf32>
    %82 = vector.shape_cast %81 : vector<1x4x4xf32> to vector<4x4xf32>
    %cst_28 = arith.constant dense<0.000000e+00> : vector<4x256xf32>
    %83 = tpu.matmul %82, %80, %cst_28 {dimension_numbers = #tpu.dot_dimension_numbers<[1], [0], [0], [1], [0, 0, 1, 1], [], []>} : vector<4x4xf32>, vector<4x256xf32>, vector<4x256xf32> -> vector<4x256xf32>
    %84 = arith.addf %75, %83 : vector<4x256xf32>
    %85 = vector.extract_strided_slice %28 {offsets = [0, 144], sizes = [4, 256], strides = [1, 1]} : vector<4x512xf32> to vector<4x256xf32>
    %86 = vector.extract_strided_slice %23 {offsets = [7, 0, 0], sizes = [1, 4, 4], strides = [1, 1, 1]} : vector<9x4x4xf32> to vector<1x4x4xf32>
    %87 = vector.shape_cast %86 : vector<1x4x4xf32> to vector<4x4xf32>
    %cst_29 = arith.constant dense<0.000000e+00> : vector<4x256xf32>
    %88 = tpu.matmul %87, %85, %cst_29 {dimension_numbers = #tpu.dot_dimension_numbers<[1], [0], [0], [1], [0, 0, 1, 1], [], []>} : vector<4x4xf32>, vector<4x256xf32>, vector<4x256xf32> -> vector<4x256xf32>
    %89 = arith.addf %84, %88 : vector<4x256xf32>
    %90 = vector.extract_strided_slice %28 {offsets = [0, 145], sizes = [4, 256], strides = [1, 1]} : vector<4x512xf32> to vector<4x256xf32>
    %cst_30 = arith.constant 0.000000e+00 : f32
    %91 = vector.shape_cast %22 : vector<1x256xi1> to vector<1x256xi1>
    %92 = vector.broadcast %91 : vector<1x256xi1> to vector<4x256xi1>
    %93 = vector.broadcast %cst_30 : f32 to vector<4x256xf32>
    %94 = arith.select %92, %90, %93 : vector<4x256xi1>, vector<4x256xf32>
    %95 = vector.extract_strided_slice %23 {offsets = [8, 0, 0], sizes = [1, 4, 4], strides = [1, 1, 1]} : vector<9x4x4xf32> to vector<1x4x4xf32>
    %96 = vector.shape_cast %95 : vector<1x4x4xf32> to vector<4x4xf32>
    %cst_31 = arith.constant dense<0.000000e+00> : vector<4x256xf32>
    %97 = tpu.matmul %96, %94, %cst_31 {dimension_numbers = #tpu.dot_dimension_numbers<[1], [0], [0], [1], [0, 0, 1, 1], [], []>} : vector<4x4xf32>, vector<4x256xf32>, vector<4x256xf32> -> vector<4x256xf32>
    %98 = arith.addf %89, %97 : vector<4x256xf32>
    %99 = vector.broadcast %25 : vector<4x1xf32> to vector<4x256xf32>
    %100 = arith.addf %98, %99 : vector<4x256xf32>
    %c0_32 = arith.constant 0 : index
    %c0_33 = arith.constant 0 : index
    %c0_34 = arith.constant 0 : index
    %101 = vector.load %arg6[%c0_32, %c0_33, %c0_34] : memref<1x4x1xf32, #tpu.memory_space<vmem>>, vector<1x4x1xf32>
    %102 = vector.shape_cast %101 : vector<1x4x1xf32> to vector<4x1xf32>
    %c0_35 = arith.constant 0 : index
    %c0_36 = arith.constant 0 : index
    %c0_37 = arith.constant 0 : index
    %103 = vector.load %arg7[%c0_35, %c0_36, %c0_37] : memref<1x4x1xf32, #tpu.memory_space<vmem>>, vector<1x4x1xf32>
    %104 = vector.shape_cast %103 : vector<1x4x1xf32> to vector<4x1xf32>
    %cst_38 = arith.constant dense<0.000000e+00> : vector<4xf32>
    %105 = vector.multi_reduction <add>, %100, %cst_38 [1] : vector<4x256xf32> to vector<4xf32>
    %106 = vector.shape_cast %105 : vector<4xf32> to vector<4x1xf32>
    %cst_39 = arith.constant 2.560000e+02 : f32
    %107 = vector.broadcast %cst_39 : f32 to vector<4x1xf32>
    %108 = arith.divf %106, %107 : vector<4x1xf32>
    %109 = vector.broadcast %108 : vector<4x1xf32> to vector<4x256xf32>
    %110 = arith.subf %100, %109 : vector<4x256xf32>
    %111 = arith.mulf %110, %110 : vector<4x256xf32>
    %cst_40 = arith.constant dense<0.000000e+00> : vector<4xf32>
    %112 = vector.multi_reduction <add>, %111, %cst_40 [1] : vector<4x256xf32> to vector<4xf32>
    %113 = vector.shape_cast %112 : vector<4xf32> to vector<4x1xf32>
    %cst_41 = arith.constant 2.560000e+02 : f32
    %114 = vector.broadcast %cst_41 : f32 to vector<4x1xf32>
    %115 = arith.divf %113, %114 : vector<4x1xf32>
    %116 = vector.broadcast %108 : vector<4x1xf32> to vector<4x256xf32>
    %117 = arith.subf %100, %116 : vector<4x256xf32>
    %cst_42 = arith.constant 9.99999974E-6 : f32
    %118 = vector.broadcast %cst_42 : f32 to vector<4x1xf32>
    %119 = arith.addf %115, %118 : vector<4x1xf32>
    %120 = math.rsqrt %119 : vector<4x1xf32>
    %121 = vector.broadcast %120 : vector<4x1xf32> to vector<4x256xf32>
    %122 = arith.mulf %117, %121 : vector<4x256xf32>
    %123 = vector.broadcast %102 : vector<4x1xf32> to vector<4x256xf32>
    %124 = arith.mulf %123, %122 : vector<4x256xf32>
    %125 = vector.broadcast %104 : vector<4x1xf32> to vector<4x256xf32>
    %126 = arith.addf %124, %125 : vector<4x256xf32>
    %cst_43 = arith.constant 0.000000e+00 : f32
    %127 = vector.broadcast %cst_43 : f32 to vector<4x256xf32>
    %128 = arith.maximumf %126, %127 : vector<4x256xf32>
    %cst_44 = arith.constant 0.000000e+00 : f32
    %129 = vector.broadcast %cst_44 : f32 to vector<4x128xf32>
    %130 = tpu.concatenate %129, %128, %129 in 1 : vector<4x128xf32>, vector<4x256xf32>, vector<4x128xf32> -> vector<4x512xf32>
    %cst_45 = arith.constant 0.000000e+00 : f32
    %131 = vector.broadcast %cst_45 : f32 to vector<4x256xf32>
    %132 = vector.extract_strided_slice %130 {offsets = [0, 111], sizes = [4, 256], strides = [1, 1]} : vector<4x512xf32> to vector<4x256xf32>
    %cst_46 = arith.constant 0.000000e+00 : f32
    %133 = vector.shape_cast %20 : vector<1x256xi1> to vector<1x256xi1>
    %134 = vector.broadcast %133 : vector<1x256xi1> to vector<4x256xi1>
    %135 = vector.broadcast %cst_46 : f32 to vector<4x256xf32>
    %136 = arith.select %134, %132, %135 : vector<4x256xi1>, vector<4x256xf32>
    %137 = vector.extract_strided_slice %24 {offsets = [0, 0, 0], sizes = [1, 4, 4], strides = [1, 1, 1]} : vector<9x4x4xf32> to vector<1x4x4xf32>
    %138 = vector.shape_cast %137 : vector<1x4x4xf32> to vector<4x4xf32>
    %cst_47 = arith.constant dense<0.000000e+00> : vector<4x256xf32>
    %139 = tpu.matmul %138, %136, %cst_47 {dimension_numbers = #tpu.dot_dimension_numbers<[1], [0], [0], [1], [0, 0, 1, 1], [], []>} : vector<4x4xf32>, vector<4x256xf32>, vector<4x256xf32> -> vector<4x256xf32>
    %140 = arith.addf %131, %139 : vector<4x256xf32>
    %141 = vector.extract_strided_slice %130 {offsets = [0, 112], sizes = [4, 256], strides = [1, 1]} : vector<4x512xf32> to vector<4x256xf32>
    %142 = vector.extract_strided_slice %24 {offsets = [1, 0, 0], sizes = [1, 4, 4], strides = [1, 1, 1]} : vector<9x4x4xf32> to vector<1x4x4xf32>
    %143 = vector.shape_cast %142 : vector<1x4x4xf32> to vector<4x4xf32>
    %cst_48 = arith.constant dense<0.000000e+00> : vector<4x256xf32>
    %144 = tpu.matmul %143, %141, %cst_48 {dimension_numbers = #tpu.dot_dimension_numbers<[1], [0], [0], [1], [0, 0, 1, 1], [], []>} : vector<4x4xf32>, vector<4x256xf32>, vector<4x256xf32> -> vector<4x256xf32>
    %145 = arith.addf %140, %144 : vector<4x256xf32>
    %146 = vector.extract_strided_slice %130 {offsets = [0, 113], sizes = [4, 256], strides = [1, 1]} : vector<4x512xf32> to vector<4x256xf32>
    %cst_49 = arith.constant 0.000000e+00 : f32
    %147 = vector.shape_cast %22 : vector<1x256xi1> to vector<1x256xi1>
    %148 = vector.broadcast %147 : vector<1x256xi1> to vector<4x256xi1>
    %149 = vector.broadcast %cst_49 : f32 to vector<4x256xf32>
    %150 = arith.select %148, %146, %149 : vector<4x256xi1>, vector<4x256xf32>
    %151 = vector.extract_strided_slice %24 {offsets = [2, 0, 0], sizes = [1, 4, 4], strides = [1, 1, 1]} : vector<9x4x4xf32> to vector<1x4x4xf32>
    %152 = vector.shape_cast %151 : vector<1x4x4xf32> to vector<4x4xf32>
    %cst_50 = arith.constant dense<0.000000e+00> : vector<4x256xf32>
    %153 = tpu.matmul %152, %150, %cst_50 {dimension_numbers = #tpu.dot_dimension_numbers<[1], [0], [0], [1], [0, 0, 1, 1], [], []>} : vector<4x4xf32>, vector<4x256xf32>, vector<4x256xf32> -> vector<4x256xf32>
    %154 = arith.addf %145, %153 : vector<4x256xf32>
    %155 = vector.extract_strided_slice %130 {offsets = [0, 127], sizes = [4, 256], strides = [1, 1]} : vector<4x512xf32> to vector<4x256xf32>
    %cst_51 = arith.constant 0.000000e+00 : f32
    %156 = vector.shape_cast %20 : vector<1x256xi1> to vector<1x256xi1>
    %157 = vector.broadcast %156 : vector<1x256xi1> to vector<4x256xi1>
    %158 = vector.broadcast %cst_51 : f32 to vector<4x256xf32>
    %159 = arith.select %157, %155, %158 : vector<4x256xi1>, vector<4x256xf32>
    %160 = vector.extract_strided_slice %24 {offsets = [3, 0, 0], sizes = [1, 4, 4], strides = [1, 1, 1]} : vector<9x4x4xf32> to vector<1x4x4xf32>
    %161 = vector.shape_cast %160 : vector<1x4x4xf32> to vector<4x4xf32>
    %cst_52 = arith.constant dense<0.000000e+00> : vector<4x256xf32>
    %162 = tpu.matmul %161, %159, %cst_52 {dimension_numbers = #tpu.dot_dimension_numbers<[1], [0], [0], [1], [0, 0, 1, 1], [], []>} : vector<4x4xf32>, vector<4x256xf32>, vector<4x256xf32> -> vector<4x256xf32>
    %163 = arith.addf %154, %162 : vector<4x256xf32>
    %164 = vector.extract_strided_slice %130 {offsets = [0, 128], sizes = [4, 256], strides = [1, 1]} : vector<4x512xf32> to vector<4x256xf32>
    %165 = vector.extract_strided_slice %24 {offsets = [4, 0, 0], sizes = [1, 4, 4], strides = [1, 1, 1]} : vector<9x4x4xf32> to vector<1x4x4xf32>
    %166 = vector.shape_cast %165 : vector<1x4x4xf32> to vector<4x4xf32>
    %cst_53 = arith.constant dense<0.000000e+00> : vector<4x256xf32>
    %167 = tpu.matmul %166, %164, %cst_53 {dimension_numbers = #tpu.dot_dimension_numbers<[1], [0], [0], [1], [0, 0, 1, 1], [], []>} : vector<4x4xf32>, vector<4x256xf32>, vector<4x256xf32> -> vector<4x256xf32>
    %168 = arith.addf %163, %167 : vector<4x256xf32>
    %169 = vector.extract_strided_slice %130 {offsets = [0, 129], sizes = [4, 256], strides = [1, 1]} : vector<4x512xf32> to vector<4x256xf32>
    %cst_54 = arith.constant 0.000000e+00 : f32
    %170 = vector.shape_cast %22 : vector<1x256xi1> to vector<1x256xi1>
    %171 = vector.broadcast %170 : vector<1x256xi1> to vector<4x256xi1>
    %172 = vector.broadcast %cst_54 : f32 to vector<4x256xf32>
    %173 = arith.select %171, %169, %172 : vector<4x256xi1>, vector<4x256xf32>
    %174 = vector.extract_strided_slice %24 {offsets = [5, 0, 0], sizes = [1, 4, 4], strides = [1, 1, 1]} : vector<9x4x4xf32> to vector<1x4x4xf32>
    %175 = vector.shape_cast %174 : vector<1x4x4xf32> to vector<4x4xf32>
    %cst_55 = arith.constant dense<0.000000e+00> : vector<4x256xf32>
    %176 = tpu.matmul %175, %173, %cst_55 {dimension_numbers = #tpu.dot_dimension_numbers<[1], [0], [0], [1], [0, 0, 1, 1], [], []>} : vector<4x4xf32>, vector<4x256xf32>, vector<4x256xf32> -> vector<4x256xf32>
    %177 = arith.addf %168, %176 : vector<4x256xf32>
    %178 = vector.extract_strided_slice %130 {offsets = [0, 143], sizes = [4, 256], strides = [1, 1]} : vector<4x512xf32> to vector<4x256xf32>
    %cst_56 = arith.constant 0.000000e+00 : f32
    %179 = vector.shape_cast %20 : vector<1x256xi1> to vector<1x256xi1>
    %180 = vector.broadcast %179 : vector<1x256xi1> to vector<4x256xi1>
    %181 = vector.broadcast %cst_56 : f32 to vector<4x256xf32>
    %182 = arith.select %180, %178, %181 : vector<4x256xi1>, vector<4x256xf32>
    %183 = vector.extract_strided_slice %24 {offsets = [6, 0, 0], sizes = [1, 4, 4], strides = [1, 1, 1]} : vector<9x4x4xf32> to vector<1x4x4xf32>
    %184 = vector.shape_cast %183 : vector<1x4x4xf32> to vector<4x4xf32>
    %cst_57 = arith.constant dense<0.000000e+00> : vector<4x256xf32>
    %185 = tpu.matmul %184, %182, %cst_57 {dimension_numbers = #tpu.dot_dimension_numbers<[1], [0], [0], [1], [0, 0, 1, 1], [], []>} : vector<4x4xf32>, vector<4x256xf32>, vector<4x256xf32> -> vector<4x256xf32>
    %186 = arith.addf %177, %185 : vector<4x256xf32>
    %187 = vector.extract_strided_slice %130 {offsets = [0, 144], sizes = [4, 256], strides = [1, 1]} : vector<4x512xf32> to vector<4x256xf32>
    %188 = vector.extract_strided_slice %24 {offsets = [7, 0, 0], sizes = [1, 4, 4], strides = [1, 1, 1]} : vector<9x4x4xf32> to vector<1x4x4xf32>
    %189 = vector.shape_cast %188 : vector<1x4x4xf32> to vector<4x4xf32>
    %cst_58 = arith.constant dense<0.000000e+00> : vector<4x256xf32>
    %190 = tpu.matmul %189, %187, %cst_58 {dimension_numbers = #tpu.dot_dimension_numbers<[1], [0], [0], [1], [0, 0, 1, 1], [], []>} : vector<4x4xf32>, vector<4x256xf32>, vector<4x256xf32> -> vector<4x256xf32>
    %191 = arith.addf %186, %190 : vector<4x256xf32>
    %192 = vector.extract_strided_slice %130 {offsets = [0, 145], sizes = [4, 256], strides = [1, 1]} : vector<4x512xf32> to vector<4x256xf32>
    %cst_59 = arith.constant 0.000000e+00 : f32
    %193 = vector.shape_cast %22 : vector<1x256xi1> to vector<1x256xi1>
    %194 = vector.broadcast %193 : vector<1x256xi1> to vector<4x256xi1>
    %195 = vector.broadcast %cst_59 : f32 to vector<4x256xf32>
    %196 = arith.select %194, %192, %195 : vector<4x256xi1>, vector<4x256xf32>
    %197 = vector.extract_strided_slice %24 {offsets = [8, 0, 0], sizes = [1, 4, 4], strides = [1, 1, 1]} : vector<9x4x4xf32> to vector<1x4x4xf32>
    %198 = vector.shape_cast %197 : vector<1x4x4xf32> to vector<4x4xf32>
    %cst_60 = arith.constant dense<0.000000e+00> : vector<4x256xf32>
    %199 = tpu.matmul %198, %196, %cst_60 {dimension_numbers = #tpu.dot_dimension_numbers<[1], [0], [0], [1], [0, 0, 1, 1], [], []>} : vector<4x4xf32>, vector<4x256xf32>, vector<4x256xf32> -> vector<4x256xf32>
    %200 = arith.addf %191, %199 : vector<4x256xf32>
    %201 = vector.broadcast %26 : vector<4x1xf32> to vector<4x256xf32>
    %202 = arith.addf %200, %201 : vector<4x256xf32>
    %c0_61 = arith.constant 0 : index
    %c0_62 = arith.constant 0 : index
    %c0_63 = arith.constant 0 : index
    %203 = vector.load %arg8[%c0_61, %c0_62, %c0_63] : memref<1x4x1xf32, #tpu.memory_space<vmem>>, vector<1x4x1xf32>
    %204 = vector.shape_cast %203 : vector<1x4x1xf32> to vector<4x1xf32>
    %c0_64 = arith.constant 0 : index
    %c0_65 = arith.constant 0 : index
    %c0_66 = arith.constant 0 : index
    %205 = vector.load %arg9[%c0_64, %c0_65, %c0_66] : memref<1x4x1xf32, #tpu.memory_space<vmem>>, vector<1x4x1xf32>
    %206 = vector.shape_cast %205 : vector<1x4x1xf32> to vector<4x1xf32>
    %cst_67 = arith.constant dense<0.000000e+00> : vector<4xf32>
    %207 = vector.multi_reduction <add>, %202, %cst_67 [1] : vector<4x256xf32> to vector<4xf32>
    %208 = vector.shape_cast %207 : vector<4xf32> to vector<4x1xf32>
    %cst_68 = arith.constant 2.560000e+02 : f32
    %209 = vector.broadcast %cst_68 : f32 to vector<4x1xf32>
    %210 = arith.divf %208, %209 : vector<4x1xf32>
    %211 = vector.broadcast %210 : vector<4x1xf32> to vector<4x256xf32>
    %212 = arith.subf %202, %211 : vector<4x256xf32>
    %213 = arith.mulf %212, %212 : vector<4x256xf32>
    %cst_69 = arith.constant dense<0.000000e+00> : vector<4xf32>
    %214 = vector.multi_reduction <add>, %213, %cst_69 [1] : vector<4x256xf32> to vector<4xf32>
    %215 = vector.shape_cast %214 : vector<4xf32> to vector<4x1xf32>
    %cst_70 = arith.constant 2.560000e+02 : f32
    %216 = vector.broadcast %cst_70 : f32 to vector<4x1xf32>
    %217 = arith.divf %215, %216 : vector<4x1xf32>
    %218 = vector.broadcast %210 : vector<4x1xf32> to vector<4x256xf32>
    %219 = arith.subf %202, %218 : vector<4x256xf32>
    %cst_71 = arith.constant 9.99999974E-6 : f32
    %220 = vector.broadcast %cst_71 : f32 to vector<4x1xf32>
    %221 = arith.addf %217, %220 : vector<4x1xf32>
    %222 = math.rsqrt %221 : vector<4x1xf32>
    %223 = vector.broadcast %222 : vector<4x1xf32> to vector<4x256xf32>
    %224 = arith.mulf %219, %223 : vector<4x256xf32>
    %225 = vector.broadcast %204 : vector<4x1xf32> to vector<4x256xf32>
    %226 = arith.mulf %225, %224 : vector<4x256xf32>
    %227 = vector.broadcast %206 : vector<4x1xf32> to vector<4x256xf32>
    %228 = arith.addf %226, %227 : vector<4x256xf32>
    %229 = arith.addf %1, %228 : vector<4x256xf32>
    %c0_72 = arith.constant 0 : index
    %c0_73 = arith.constant 0 : index
    %c0_74 = arith.constant 0 : index
    %230 = vector.load %arg10[%c0_72, %c0_73, %c0_74] : memref<1x4x256xf32, #tpu.memory_space<vmem>>, vector<1x4x256xf32>
    %231 = vector.shape_cast %230 : vector<1x4x256xf32> to vector<4x256xf32>
    %232 = vector.shape_cast %229 : vector<4x256xf32> to vector<1x4x256xf32>
    tpu.vector_store %arg10[%c0_72, %c0_73, %c0_74], %232 {strides = array<i32>} : memref<1x4x256xf32, #tpu.memory_space<vmem>>, vector<1x4x256xf32>,
    return
  }
  func.func @transform_0(%arg0: i32) -> (i32, i32, i32) {
    %c0_i32 = arith.constant 0 : i32
    %c0_i32_0 = arith.constant 0 : i32
    %c0_i32_1 = arith.constant 0 : i32
    return %arg0, %c0_i32, %c0_i32_0 : i32, i32, i32
  }
  func.func @transform_1(%arg0: i32) -> (i32, i32, i32) {
    %c0_i32 = arith.constant 0 : i32
    %c0_i32_0 = arith.constant 0 : i32
    %c0_i32_1 = arith.constant 0 : i32
    %c0_i32_2 = arith.constant 0 : i32
    return %c0_i32, %c0_i32_0, %c0_i32_1 : i32, i32, i32
  }
  func.func @transform_2(%arg0: i32) -> (i32, i32) {
    %c0_i32 = arith.constant 0 : i32
    %c0_i32_0 = arith.constant 0 : i32
    %c0_i32_1 = arith.constant 0 : i32
    return %c0_i32, %c0_i32_0 : i32, i32
  }
  func.func @transform_3(%arg0: i32) -> (i32, i32, i32) {
    %c0_i32 = arith.constant 0 : i32
    %c0_i32_0 = arith.constant 0 : i32
    %c0_i32_1 = arith.constant 0 : i32
    %c0_i32_2 = arith.constant 0 : i32
    return %c0_i32, %c0_i32_0, %c0_i32_1 : i32, i32, i32
  }
  func.func @transform_4(%arg0: i32) -> (i32, i32) {
    %c0_i32 = arith.constant 0 : i32
    %c0_i32_0 = arith.constant 0 : i32
    %c0_i32_1 = arith.constant 0 : i32
    return %c0_i32, %c0_i32_0 : i32, i32
  }
  func.func @transform_5(%arg0: i32) -> (i32, i32, i32) {
    %c0_i32 = arith.constant 0 : i32
    %c0_i32_0 = arith.constant 0 : i32
    %c0_i32_1 = arith.constant 0 : i32
    return %arg0, %c0_i32, %c0_i32_0 : i32, i32, i32
  }
  func.func @transform_6(%arg0: i32) -> (i32, i32, i32) {
    %c0_i32 = arith.constant 0 : i32
    %c0_i32_0 = arith.constant 0 : i32
    %c0_i32_1 = arith.constant 0 : i32
    return %arg0, %c0_i32, %c0_i32_0 : i32, i32, i32
  }
  func.func @transform_7(%arg0: i32) -> (i32, i32, i32) {
    %c0_i32 = arith.constant 0 : i32
    %c0_i32_0 = arith.constant 0 : i32
    %c0_i32_1 = arith.constant 0 : i32
    return %arg0, %c0_i32, %c0_i32_0 : i32, i32, i32
  }
  func.func @transform_8(%arg0: i32) -> (i32, i32, i32) {
    %c0_i32 = arith.constant 0 : i32
    %c0_i32_0 = arith.constant 0 : i32
    %c0_i32_1 = arith.constant 0 : i32
    return %arg0, %c0_i32, %c0_i32_0 : i32, i32, i32
  }
  func.func @transform_9(%arg0: i32) -> (i32, i32, i32) {
    %c0_i32 = arith.constant 0 : i32
    %c0_i32_0 = arith.constant 0 : i32
    %c0_i32_1 = arith.constant 0 : i32
    return %arg0, %c0_i32, %c0_i32_0 : i32, i32, i32
  }
}

</mosaic_0001>

<bundles_post_ra>
// kernel: tpu_custom_call.1
= control target key start
LH: loop header
LB: loop body
LE: loop exit
PB: predicated region body
PF: predicated region fallthrough
CT: control target
= control target key end

     0   :  { %14 = vsyncpa [#allocation3], 0  ;;  %s3066_s0 = inlined_call_operand.vmem [shape: f32[2,4,256], index: 0, kind: input, shape index: {}]   ;;  %s3067_s1 = inlined_call_operand.vmem [shape: f32[9,4,4], index: 1, kind: input, shape index: {}]   ;;  %s3068_s2 = inlined_call_operand.vmem [shape: f32[4,1], index: 2, kind: input, shape index: {}]   ;;  %s3069_s3 = inlined_call_operand.vmem [shape: f32[9,4,4], index: 3, kind: input, shape index: {}]   ;;  %s3070_s4 = inlined_call_operand.vmem [shape: f32[4,1], index: 4, kind: input, shape index: {}]   ;;  %s3071_s5 = inlined_call_operand.vmem [shape: f32[2,4,1], index: 5, kind: input, shape index: {}]   ;;  %s3072_s6 = inlined_call_operand.vmem [shape: f32[2,4,1], index: 6, kind: input, shape index: {}]   ;;  %s3073_s7 = inlined_call_operand.vmem [shape: f32[2,4,1], index: 7, kind: input, shape index: {}]   ;;  %s3074_s8 = inlined_call_operand.vmem [shape: f32[2,4,1], index: 8, kind: input, shape index: {}]   ;;  %s3075_s9 = inlined_call_operand.hbm [shape: f32[2,4,256], index: 9, kind: output, shape index: {}]  }
   0x1   :  { %16 = vsyncpa [#allocation3 + $0x1], 0  ;;  %s2592_s30 = smov 0   ;;  %s2594_s10 = smov 0  }
   0x2   :  { %s2596_s11 = smov 0   ;;  %s2598_s12 = smov 0  }
   0x3 LB: > { %s2613_s13 = sadd.s32 4294967295, %s2529_s12   ;;  %s2307_s14 = sadd.s32 4294967294, %s2529_s12   ;;  %s2529_s12 = sphi %s2598_s12, %s3095_s12   ;;  %s2525_s11 = sphi %s2596_s11, %s3094_s11   ;;  %s2521_s10 = sphi %s2594_s10, %s3093_s10   ;;  %s2517_s30 = sphi %s2592_s30, %s3092_s30  }
   0x4   : > { %s2617_s15 = sadd.s32 1, %s2529_s12   ;;  %s243_s16 = sadd.s32 1, %s2525_s11 }
   0x5   : > { %s240_s17 = ssub.s32 %s2529_s12, %s2617_s15  ;;  %p253_p0 = scmp.ne.s32.totalorder %s2525_s11, %s2521_s10 }
   0x6   : > { %p241_p1 = scmp.eq.s32.totalorder %s240_s17, 0  ;;  %p254_p2 = scmp.eq.s32.totalorder %s2613_s13, 1 }
   0x7   : > { %p259_p3 = scmp.ne.s32.totalorder %s2521_s10, %s2517_s30  ;;  %p260_p4 = scmp.eq.s32.totalorder %s2307_s14, 1 }
   0x8   : > { %s2628_s18 = scalar_select %p241_p1, %s2525_s11, %s243_s16  }
   0x9   : > { %p2630_p5 = por %p254_p2, %p253_p0  ;;  %p2634_p6 = por %p260_p4, %p259_p3 }
   0xa   : > { %p2310_p7 = scmp.ge.s32.totalorder %s2529_s12, 1  ;;  %p326_p8 = scmp.lt.s32.totalorder %s2529_s12, 3 }
   0xc   : > { %p327_p9 = pnand %p2310_p7, %p326_p8 }
   0xd   : > { %p378_p10 = scmp.lt.s32.totalorder (!%p327_p9), %s2613_s13, 1  ;;  %v2531_v0 = vmov (!%p327_p9), 0.0   ;;  %s2532_s21 = smov (!%p327_p9), 16   ;;  %v449_v3 = vld [vmem:[%s3068_s2] sm:$0xf] (!%p327_p9)  ;;  %v2540_v4 = vmov (!%p327_p9), 0   ;;  %v400_v5 = vlaneseq (!%p327_p9) }
   0xe   : > { %330 = sbr.rel (%p327_p9) target bundleno = 1482 (0x5ca), region = 56  ;;  %471 = vrot.lane.b32.xlu1 (!%p327_p9), %v2531_v0, %s2532_s21  ;;  %553 = vmatprep.mubr.f32.mxu0 (!%p327_p9), %v2531_v0  ;;  %s2533_s27 = smov (!%p327_p9), 17   ;;  %vm464_vm0 = vcmask (!%p327_p9), 138240   ;;  %vm477_vm1 = vcmask (!%p327_p9), 130048   ;;  %vm484_vm2 = vcmask (!%p327_p9), 1043456   ;;  %vm480_vm3 = vcmask (!%p327_p9), 31744  }
   0xf   : > { %1423 = vmatprep.mubr.f32.mxu1 (!%p327_p9), %v2531_v0  ;;  %s2534_s28 = smov (!%p327_p9), 15   ;;  %s2535_s29 = smov (!%p327_p9), 1   ;;  %2460 = vset.pattern.permute.xlu0 (!%p327_p9), %v2540_v4  ;;  %v401_v7 = vand.u32 (!%p327_p9), 127, %v400_v5  ;;  %v432_v16 = vld [vmem:[%s3067_s1 + $0x4] sm:$0xf] (!%p327_p9)  ;;  %vm650_vm6 = vcmask (!%p327_p9), 121856  }
  0x10   : > { %s2536_s14 = smov (!%p327_p9), 127   ;;  %s2537_s16 = smov (!%p327_p9), 113   ;;  %2461 = vset.pattern.permute.xlu1 (!%p327_p9), %v2540_v4  ;;  %v431_v30 = vld [vmem:[%s3067_s1] sm:$0xf] (!%p327_p9)  ;;  %vm745_vm9 = vcmask (!%p327_p9), 7168   ;;  %vm920_vm10 = vcmask (!%p327_p9), 1039360  }
  0x11   : > { %s3078_s17 = smov (!%p327_p9), 112   ;;  %v402_v8 = vadd.s32 (!%p327_p9), 128, %v401_v7  ;;  %v407_v11 = vand.u32 (!%p327_p9), 15, %v401_v7  ;;  %v433_v40 = vld [vmem:[%s3067_s1 + $0x8] sm:$0xf] (!%p327_p9)  ;;  %vm1015_vm11 = vcmask (!%p327_p9), 924672  }
  0x12   : > { %v434_v46 = vld [vmem:[%s3067_s1 + $0xc] sm:$0xf] (!%p327_p9)  ;;  %v435_v53 = vld [vmem:[%s3067_s1 + $0x10] sm:$0xf] (!%p327_p9)  ;;  %vm1110_vm12 = vcmask (!%p327_p9), 916480   ;;  %vm1199_vm13 = vcmask (!%p327_p9), 908288  }
  0x13   : > { %v414_v12 = vand.u32 (!%p327_p9), 15, %v402_v8  ;;  %vm2715_vm4 = vcmp.ge.s32.totalorder (!%p327_p9), %v407_v11, 1  ;;  %vm2749_vm8 = vcmp.le.s32.totalorder (!%p327_p9), %v407_v11, 14  ;;  %v436_v60 = vld [vmem:[%s3067_s1 + $0x14] sm:$0xf] (!%p327_p9)  ;;  %s3090_s25 = smov (!%p327_p9), 112  }
  0x14   : > { %v437_v5 = vld [vmem:[%s3067_s1 + $0x18] sm:$0xf] (!%p327_p9)  ;;  %v438_v11 = vld [vmem:[%s3067_s1 + $0x1c] sm:$0xf] (!%p327_p9)  ;;  %v448_v26 = vld [vmem:[%s3069_s3 + $0x20] sm:$0xf] (!%p327_p9) }
  0x15   : > { %s2645_s22 = scalar_select %p378_p10, %s2613_s13, 1  ;;  %vm2725_vm5 = vcmp.ge.s32.totalorder %v414_v12, 1  ;;  %vm2737_vm7 = vcmp.le.s32.totalorder %v414_v12, 14 }
  0x17   : > { %s2377_s23 = sshll.u32 %s2645_s22, 3 }
  0x18   : > { %s382_s26 = scalar_lea.vmem %s3066_s0, %s2377_s23  ;;  %s3076_s23 = smov 111  }
  0x19   : > { %v2652_v1 = vld [vmem:[%s382_s26] sm:$0xff] }
  0x1a   : > { %473 = vrot.lane.b32.xlu0 %v2652_v1, %s2532_s21  ;;  %460 = vrot.lane.b32.xlu1 %v2652_v1, %s2533_s27  ;;  %v2660_v2 = vcombine.high %v2652_v1, %v2652_v1 }
  0x1e   : > { %475 = vrot.lane.b32.xlu0 %v2660_v2, %s2532_s21  ;;  %458 = vrot.lane.b32.xlu1 %v2531_v0, %s2533_s27 }
  0x22   : > { %462 = vrot.lane.b32.xlu0 %v2660_v2, %s2533_s27  ;;  %648 = vrot.lane.b32.xlu1 %v2660_v2, %s2534_s28 }
  0x26   : > { %646 = vrot.lane.b32.xlu0 %v2652_v1, %s2534_s28  ;;  %741 = vrot.lane.b32.xlu1 %v2652_v1, %s2535_s29 }
  0x2a   : > { %644 = vrot.lane.b32.xlu0 %v2531_v0, %s2534_s28  ;;  %739 = vrot.lane.b32.xlu1 %v2531_v0, %s2535_s29 }
  0x2e   : > { %743 = vrot.lane.b32.xlu0 %v2660_v2, %s2535_s29  ;;  %918 = vrot.lane.b32.xlu1 %v2531_v0, %s2536_s14 }
  0x32   : > { %916 = vrot.lane.b32.xlu0 %v2660_v2, %s2536_s14  ;;  %1011 = vrot.lane.b32.xlu1 %v2660_v2, %s2537_s16 }
  0x36   : > { %914 = vrot.lane.b32.xlu0 %v2652_v1, %s2536_s14  ;;  %1009 = vrot.lane.b32.xlu1 %v2652_v1, %s2537_s16 }
  0x3a   : > { %1013 = vrot.lane.b32.xlu0 %v2531_v0, %s2537_s16  ;;  %1108 = vrot.lane.b32.xlu1 %v2531_v0, %s3078_s17 }
  0x3e   : > { %1106 = vrot.lane.b32.xlu0 %v2660_v2, %s3078_s17  ;;  %1195 = vrot.lane.b32.xlu1 %v2660_v2, %s3076_s23 }
  0x42   : > { %1104 = vrot.lane.b32.xlu0 %v2652_v1, %s3078_s17  ;;  %1193 = vrot.lane.b32.xlu1 %v2652_v1, %s3076_s23 }
  0x46   : > { %1197 = vrot.lane.b32.xlu0 %v2531_v0, %s3076_s23  ;;  %s2854_s23 = sshll.u32 %s2645_s22, 2 }
  0x47   : > { %s386_s26 = scalar_lea.vmem %s3071_s5, %s2854_s23  ;;  %s390_s17 = scalar_lea.vmem %s3072_s6, %s2854_s23 }
  0x4a   : > { %1290 = vperm.xlu0 %2460, %v449_v3  }
  0x80   : > { %v2707_v6 = vpop.permute.xlu1 %471 }
  0x8c   : > { %v474_v9 = vpop.permute.xlu0 %473  ;;  %v461_v10 = vpop.permute.xlu1 %460 }
  0x8d   : > { %v478_v19 = vsel %vm477_vm1, %v2707_v6, %v474_v9 }
  0x90   : > { %v476_v13 = vpop.permute.xlu0 %475  ;;  %v2709_v14 = vpop.permute.xlu1 %458 }
  0x91   : > { %v479_v15 = vsel %vm477_vm1, %v474_v9, %v476_v13  ;;  %v465_v18 = vsel %vm464_vm0, %v2709_v14, %v461_v10  ;;  %v439_v13 = vld [vmem:[%s3067_s1 + $0x20] sm:$0xf] }
  0x92   : > { %2318 = vmatprep.subr.msk.mxu0 %vm484_vm2, %v479_v15  ;;  %v469_v23 = vsel %vm2715_vm4, %v465_v18, 0.0 }
  0x93   : > { %2319 = vmatpush1.msk.msra.mxu0 %vm484_vm2, %v478_v19 }
  0x94   : > { %2320 = vmatmul.mubr.msk.f32.vlgmr.msra.gmra.mrb[0].mxu0 %vm480_vm3, %v432_v16  ;;  %v463_v21 = vpop.permute.xlu0 %462  ;;  %v649_v22 = vpop.permute.xlu1 %648 }
  0x95   : > { %v466_v24 = vsel %vm464_vm0, %v461_v10, %v463_v21  ;;  %633 = vmatprep.mubr.f32.mxu0 %v2531_v0 }
  0x96   : > { %v470_v25 = vsel %vm2725_vm5, %v466_v24, 0.0 }
  0x97   : > { %2321 = vmatprep.subr.msk.mxu0 %vm484_vm2, %v470_v25  ;;  %v1295_v25 = vld [vmem:[%s386_s26] sm:$0xf]  ;;  %s3091_s26 = smov 111  }
  0x98   : > { %2322 = vmatpush1.msk.msra.mxu0 %vm484_vm2, %v469_v23  ;;  %v647_v27 = vpop.permute.xlu0 %646  ;;  %v742_v28 = vpop.permute.xlu1 %741 }
  0x99   : > { %v652_v29 = vsel %vm650_vm6, %v647_v27, %v649_v22 }
  0x9a   : > { %v656_v31 = vsel %vm2737_vm7, %v652_v29, 0.0 }
  0x9b   : > { %2324 = vmatprep.subr.msk.mxu0 %vm484_vm2, %v656_v31 }
  0x9c   : > { %2323 = vmatmul.mubr.msk.f32.vlgmr.msra.gmra.mrb[0].mxu0 %vm480_vm3, %v431_v30  ;;  %v2754_v33 = vpop.permute.xlu0 %644  ;;  %v2756_v34 = vpop.permute.xlu1 %739 }
  0x9d   : > { %v651_v35 = vsel %vm650_vm6, %v2754_v33, %v647_v27  ;;  %730 = vmatprep.mubr.f32.mxu0 %v2531_v0  ;;  %v746_v37 = vsel %vm745_vm9, %v2756_v34, %v742_v28 }
  0x9e   : > { %v655_v36 = vsel %vm2749_vm8, %v651_v35, 0.0  ;;  %v750_v42 = vsel %vm2715_vm4, %v746_v37, 0.0 }
  0x9f   : > { %2325 = vmatpush1.msk.msra.mxu0 %vm484_vm2, %v655_v36 }
  0xa0   : > { %v744_v38 = vpop.permute.xlu0 %743  ;;  %v2778_v44 = vpop.permute.xlu1 %918 }
  0xa1   : > { %v747_v39 = vsel %vm745_vm9, %v742_v28, %v744_v38 }
  0xa2   : > { %v751_v41 = vsel %vm2725_vm5, %v747_v39, 0.0  ;;  %v1296_v39 = vld [vmem:[%s390_s17] sm:$0xf] }
  0xa3   : > { %2327 = vmatprep.subr.msk.mxu0 %vm484_vm2, %v751_v41 }
  0xa4   : > { %2326 = vmatmul.mubr.msk.f32.vlgmr.msra.gmra.mrb[0].mxu0 %vm480_vm3, %v433_v40  ;;  %v917_v43 = vpop.permute.xlu0 %916  ;;  %v1012_v50 = vpop.permute.xlu1 %1011 }
  0xa5   : > { %2328 = vmatpush1.msk.msra.mxu0 %vm484_vm2, %v750_v42  ;;  %825 = vmatprep.mubr.f32.mxu0 %v2531_v0  ;;  %v922_v45 = vsel %vm920_vm10, %v917_v43, %v2778_v44 }
  0xa6   : > { %2330 = vmatprep.subr.msk.mxu0 %vm484_vm2, %v2660_v2  ;;  %v926_v48 = vsel %vm2737_vm7, %v922_v45, 0.0 }
  0xa8   : > { %v915_v47 = vpop.permute.xlu0 %914  ;;  %v1010_v57 = vpop.permute.xlu1 %1009 }
  0xa9   : > { %v921_v51 = vsel %vm920_vm10, %v915_v47, %v917_v43  ;;  %v1016_v58 = vsel %vm1015_vm11, %v1010_v57, %v1012_v50 }
  0xaa   : > { %v925_v54 = vsel %vm2749_vm8, %v921_v51, 0.0  ;;  %v1020_v62 = vsel %vm2715_vm4, %v1016_v58, 0.0 }
  0xac   : > { %2329 = vmatmul.mubr.msk.f32.vlgmr.msra.gmra.mrb[0].mxu0 %vm480_vm3, %v434_v46  ;;  %v2793_v49 = vpop.permute.xlu0 %1013  ;;  %v2811_v59 = vpop.permute.xlu1 %1108 }
  0xad   : > { %2331 = vmatpush1.msk.msra.mxu0 %vm484_vm2, %v2652_v1  ;;  %905 = vmatprep.mubr.f32.mxu0 %v2531_v0  ;;  %v1017_v52 = vsel %vm1015_vm11, %v1012_v50, %v2793_v49 }
  0xae   : > { %2333 = vmatprep.subr.msk.mxu0 %vm484_vm2, %v926_v48  ;;  %v1021_v55 = vsel %vm2725_vm5, %v1017_v52, 0.0 }
  0xb0   : > { %v1107_v56 = vpop.permute.xlu0 %1106  ;;  %v1196_v3 = vpop.permute.xlu1 %1195 }
  0xb1   : > { %v1112_v63 = vsel %vm1110_vm12, %v1107_v56, %v2811_v59 }
  0xb4   : > { %2332 = vmatmul.mubr.msk.f32.vlgmr.msra.gmra.mrb[0].mxu0 %vm480_vm3, %v435_v53  ;;  %v1105_v61 = vpop.permute.xlu0 %1104  ;;  %v1194_v9 = vpop.permute.xlu1 %1193 }
  0xb5   : > { %2334 = vmatpush1.msk.msra.mxu0 %vm484_vm2, %v925_v54  ;;  %1000 = vmatprep.mubr.f32.mxu0 %v2531_v0  ;;  %v1111_v7 = vsel %vm1110_vm12, %v1105_v61, %v1107_v56  ;;  %v1200_v10 = vsel %vm1199_vm13, %v1194_v9, %v1196_v3  ;;  %v450_v56 = vld [vmem:[%s3070_s4] sm:$0xf] }
  0xb6   : > { %2336 = vmatprep.subr.msk.mxu0 %vm484_vm2, %v1021_v55  ;;  %v1204_v12 = vsel %vm2749_vm8, %v1200_v10, 0.0 }
  0xb8   : > { %v2823_v2 = vpop.permute.xlu0 %1197 }
  0xb9   : > { %v1201_v4 = vsel %vm1199_vm13, %v1196_v3, %v2823_v2 }
  0xba   : > { %v1205_v8 = vsel %vm2737_vm7, %v1201_v4, 0.0 }
  0xbc   : > { %2335 = vmatmul.mubr.msk.f32.vlgmr.msra.gmra.mrb[0].mxu0 %vm480_vm3, %v436_v60 }
  0xbd   : > { %2337 = vmatpush1.msk.msra.mxu0 %vm484_vm2, %v1020_v62  ;;  %1095 = vmatprep.mubr.f32.mxu0 %v2531_v0  ;;  %v441_v62 = vld [vmem:[%s3069_s3 + $0x4] sm:$0xf] }
  0xbe   : > { %2339 = vmatprep.subr.msk.mxu0 %vm484_vm2, %v1112_v63 }
  0xc4   : > { %2338 = vmatmul.mubr.msk.f32.vlgmr.msra.gmra.mrb[0].mxu0 %vm480_vm3, %v437_v5 }
  0xc5   : > { %2340 = vmatpush1.msk.msra.mxu0 %vm484_vm2, %v1111_v7  ;;  %1184 = vmatprep.mubr.f32.mxu0 %v2531_v0 }
  0xc6   : > { %2342 = vmatprep.subr.msk.mxu0 %vm484_vm2, %v1205_v8 }
  0xc9   : > { %v1291_v15 = vpop.permute.xlu0 %1290 }
  0xcc   : > { %2341 = vmatmul.mubr.msk.f32.vlgmr.msra.gmra.mrb[0].mxu0 %vm480_vm3, %v438_v11  ;;  %v440_v11 = vld [vmem:[%s3069_s3] sm:$0xf] }
  0xcd   : > { %2343 = vmatpush1.msk.msra.mxu0 %vm484_vm2, %v1204_v12  ;;  %1279 = vmatprep.mubr.f32.mxu0 %v2531_v0 }
  0xd4   : > { %2344 = vmatmul.mubr.msk.f32.vlgmr.msra.gmra.mrb[0].mxu0 %vm480_vm3, %v439_v13 }
 0x1a7   : > { %v1281_v16 = vpop.f32.mrb[0].mxu0 }
 0x1a8   : > { %v1293_v18 = vadd.f32 %v1291_v15, %v1281_v16  ;;  %v1283_v19 = vpop.f32.mrb[1].mxu0 }
 0x1a9   : > { %v1294_v21 = vadd.f32 %v1291_v15, %v1283_v19 }
 0x1aa   : > { %v1297_v22 = vsel %vm484_vm2, %v1293_v18, 0.0 }
 0x1ab   : > { %v1298_v23 = vsel %vm484_vm2, %v1294_v21, 0.0 }
 0x1ac   : > { %v1299_v24 = vadd.f32 %v1298_v23, %v1297_v22 }
 0x1ae   : > { %1300 = vadd.xlane.f32.xlu1 %v1299_v24 }
 0x1bf   : > { %1320 = vperm.xlu1 %2461, %v1295_v25  }
 0x23b   : > { %v1301_v27 = vpop.xlane.xlu1 %1300 }
 0x23c   : > { %v1303_v28 = vmul.f32 0.00390625, %v1301_v27 }
 0x23e   : > { %v1304_v29 = vsub.f32 %v1293_v18, %v1303_v28  ;;  %v1305_v30 = vsub.f32 %v1294_v21, %v1303_v28  ;;  %v442_v21 = vld [vmem:[%s3069_s3 + $0x8] sm:$0xf] }
 0x23f   : > { %v1321_v45 = vpop.permute.xlu1 %1320 }
 0x240   : > { %v1306_v31 = vmul.f32 %v1304_v29, %v1304_v29  ;;  %v1307_v35 = vmul.f32 %v1305_v30, %v1305_v30 }
 0x242   : > { %v1308_v36 = vsel %vm484_vm2, %v1306_v31, 0.0  ;;  %v1309_v37 = vsel %vm484_vm2, %v1307_v35, 0.0 }
 0x243   : > { %v1310_v38 = vadd.f32 %v1309_v37, %v1308_v36 }
 0x245   : > { %1311 = vadd.xlane.f32.xlu0 %v1310_v38 }
 0x25b   : > { %1327 = vperm.xlu0 %2460, %v1296_v39  }
 0x2d2   : > { %v1312_v40 = vpop.xlane.xlu0 %1311 }
 0x2d3   : > { %v1313_v41 = vmul.f32 0.00390625, %v1312_v40 }
 0x2d5   : > { %v1314_v42 = vadd.f32 1e-05, %v1313_v41 }
 0x2d7   : > { %2463 = vrsqrt.f32 %v1314_v42  ;;  %v446_v42 = vld [vmem:[%s3069_s3 + $0x18] sm:$0xf] }
 0x2da   : > { %v1328_v51 = vpop.permute.xlu0 %1327 }
 0x2e1   : > { %v2464_v43 = vpop.eup %2463 }
 0x2e2   : > { %v1316_v46 = vmul.f32 %v2464_v43, %v1304_v29  ;;  %v1317_v47 = vmul.f32 %v2464_v43, %v1305_v30 }
 0x2e4   : > { %v1323_v48 = vmul.f32 %v1321_v45, %v1316_v46  ;;  %v1324_v50 = vmul.f32 %v1321_v45, %v1317_v47 }
 0x2e6   : > { %v1330_v52 = vadd.f32 %v1328_v51, %v1323_v48  ;;  %v1331_v53 = vadd.f32 %v1328_v51, %v1324_v50 }
 0x2e8   : > { %v2866_v54 = vmax.f32 %v1330_v52, 0.0  ;;  %v1333_v55 = vmax.f32 %v1331_v53, 0.0 }
 0x2ea   : > { %1336 = vrot.lane.b32.xlu0 %v2866_v54, %s2533_s27  ;;  %1346 = vrot.lane.b32.xlu1 %v2866_v54, %s2532_s21 }
 0x2ee   : > { %1510 = vrot.lane.b32.xlu0 %v2866_v54, %s2534_s28  ;;  %1348 = vrot.lane.b32.xlu1 %v1333_v55, %s2532_s21  ;;  %s398_s21 = scalar_lea.vmem %s3074_s8, %s2854_s23 }
 0x2f2   : > { %1602 = vrot.lane.b32.xlu0 %v2866_v54, %s2535_s29  ;;  %1338 = vrot.lane.b32.xlu1 %v1333_v55, %s2533_s27 }
 0x2f6   : > { %1776 = vrot.lane.b32.xlu0 %v1333_v55, %s2536_s14  ;;  %1512 = vrot.lane.b32.xlu1 %v1333_v55, %s2534_s28 }
 0x2fa   : > { %1868 = vrot.lane.b32.xlu0 %v1333_v55, %s2537_s16  ;;  %1604 = vrot.lane.b32.xlu1 %v1333_v55, %s2535_s29  ;;  %s394_s29 = scalar_lea.vmem %s3073_s7, %s2854_s23  ;;  %s2378_s23 = sshll.u32 %s2613_s13, 7 }
 0x2fb   : > { %s2541_s13 = smov [#allocation2]  }
 0x2fc   : > { %s2471_s28 = sshll.u32 %s2541_s13, 4  ;;  %s2472_s28 = int_to_ptr.vmem [resolvable:$false] %s2471_s28 }
 0x2fe   : > { %1960 = vrot.lane.b32.xlu0 %v1333_v55, %s3090_s25  ;;  %1774 = vrot.lane.b32.xlu1 %v2866_v54, %s2536_s14  ;;  %s375_s14 = sand.u32 1, %s2521_s10  }
 0x302   : > { %2046 = vrot.lane.b32.xlu0 %v1333_v55, %s3091_s26  ;;  %1866 = vrot.lane.b32.xlu1 %v2866_v54, %s2537_s16  ;;  %s2311_s16 = sshll.u32 %s375_s14, 3 }
 0x303   : > { %s377_s22 = scalar_lea.vmem [#allocation2], %s2311_s16 }
 0x304   : > { %s2200_s24 = sshll.u32 %s377_s22, 4  ;;  %s3026_s24 = int_to_ptr.vmem [resolvable:$true] %s2200_s24 }
 0x305   : > { %s2467_s27 = scalar_lea.vmem %s3026_s24, 128  ;;  %p2474_p0 = scmp.lt.s32.totalorder %s3026_s24, %s2472_s28 }
 0x306   : > { %2138 = vperm.xlu0 %2460, %v450_v56   ;;  %1958 = vrot.lane.b32.xlu1 %v2866_v54, %s3090_s25  ;;  %p2468_p11 = scmp.ne.s32.totalorder %s3026_s24, %s2467_s27 }
 0x308   : > { %p2469_p12 = pnand %p2468_p11, %p2630_p5 }
 0x30a   : > { %2044 = vrot.lane.b32.xlu1 %v2866_v54, %s3091_s26  ;;  %s3024_s26 = scalar_lea.hbm %s3075_s9, %s2378_s23  ;;  %p2470_p13 = pneg %p2469_p12 }
 0x35c   : > { %v1347_v57 = vpop.permute.xlu1 %1346  ;;  %v1337_v58 = vpop.permute.xlu0 %1336 }
 0x35d   : > { %v1350_v63 = vsel %vm477_vm1, %v2707_v6, %v1347_v57  ;;  %v1340_v3 = vsel %vm464_vm0, %v2709_v14, %v1337_v58 }
 0x35e   : > { %v1344_v9 = vsel %vm2715_vm4, %v1340_v3, 0.0 }
 0x360   : > { %v1349_v60 = vpop.permute.xlu1 %1348  ;;  %v1511_v7 = vpop.permute.xlu0 %1510 }
 0x361   : > { %v1351_v61 = vsel %vm477_vm1, %v1347_v57, %v1349_v60  ;;  %v1514_v14 = vsel %vm650_vm6, %v2754_v33, %v1511_v7 }
 0x362   : > { %2345 = vmatprep.subr.msk.mxu1 %vm484_vm2, %v1351_v61  ;;  %v1518_v13 = vsel %vm2749_vm8, %v1514_v14, 0.0 }
 0x363   : > { %2346 = vmatpush1.msk.msra.mxu1 %vm484_vm2, %v1350_v63 }
 0x364   : > { %2347 = vmatmul.mubr.msk.f32.vlgmr.msra.gmra.mrb[0].mxu1 %vm480_vm3, %v441_v62  ;;  %v1339_v4 = vpop.permute.xlu1 %1338  ;;  %v1603_v15 = vpop.permute.xlu0 %1602 }
 0x365   : > { %v1341_v5 = vsel %vm464_vm0, %v1337_v58, %v1339_v4  ;;  %1503 = vmatprep.mubr.f32.mxu1 %v2531_v0  ;;  %v1606_v19 = vsel %vm745_vm9, %v2756_v34, %v1603_v15  ;;  %v443_v34 = vld [vmem:[%s3069_s3 + $0xc] sm:$0xf] }
 0x366   : > { %v1345_v8 = vsel %vm2725_vm5, %v1341_v5, 0.0  ;;  %v1610_v22 = vsel %vm2715_vm4, %v1606_v19, 0.0  ;;  %v2143_v5 = vld [vmem:[%s394_s29] sm:$0xf]  ;;  %s2473_s29 = scalar_lea.vmem %s2472_s28, 256 }
 0x367   : > { %2348 = vmatprep.subr.msk.mxu1 %vm484_vm2, %v1345_v8  ;;  %p2475_p1 = scmp.lt.s32.totalorder %s2473_s29, %s2467_s27 }
 0x368   : > { %2349 = vmatpush1.msk.msra.mxu1 %vm484_vm2, %v1344_v9  ;;  %v1513_v6 = vpop.permute.xlu1 %1512  ;;  %v1777_v23 = vpop.permute.xlu0 %1776 }
 0x369   : > { %v1515_v10 = vsel %vm650_vm6, %v1511_v7, %v1513_v6  ;;  %v1779_v24 = vsel %vm920_vm10, %v1777_v23, %v2778_v44  ;;  %v444_v44 = vld [vmem:[%s3069_s3 + $0x10] sm:$0xf]  ;;  %p2476_p2 = por %p2475_p1, %p2474_p0 }
 0x36a   : > { %v1519_v12 = vsel %vm2737_vm7, %v1515_v10, 0.0  ;;  %v1783_v25 = vsel %vm2737_vm7, %v1779_v24, 0.0 }
 0x36b   : > { %2351 = vmatprep.subr.msk.mxu1 %vm484_vm2, %v1519_v12  ;;  %p2477_p3 = pnand %p2476_p2, %p2470_p13 }
 0x36c   : > { %2350 = vmatmul.mubr.msk.f32.vlgmr.msra.gmra.mrb[0].mxu1 %vm480_vm3, %v440_v11  ;;  %v1605_v16 = vpop.permute.xlu1 %1604  ;;  %v1869_v28 = vpop.permute.xlu0 %1868 }
 0x36d   : > { %2352 = vmatpush1.msk.msra.mxu1 %vm484_vm2, %v1518_v13  ;;  %v1607_v33 = vsel %vm745_vm9, %v1603_v15, %v1605_v16  ;;  %1593 = vmatprep.mubr.f32.mxu1 %v2531_v0  ;;  %v1871_v30 = vsel %vm1015_vm11, %v1869_v28, %v2793_v49  ;;  %v445_v49 = vld [vmem:[%s3069_s3 + $0x14] sm:$0xf] }
 0x36e   : > { %v1611_v18 = vsel %vm2725_vm5, %v1607_v33, 0.0  ;;  %v1875_v35 = vsel %vm2725_vm5, %v1871_v30, 0.0 }
 0x36f   : > { %2354 = vmatprep.subr.msk.mxu1 %vm484_vm2, %v1611_v18 }
 0x370   : > { %v1775_v27 = vpop.permute.xlu1 %1774  ;;  %v1961_v37 = vpop.permute.xlu0 %1960 }
 0x371   : > { %v1778_v29 = vsel %vm920_vm10, %v1775_v27, %v1777_v23  ;;  %v1963_v20 = vsel %vm1110_vm12, %v1961_v37, %v2811_v59 }
 0x372   : > { %v1782_v31 = vsel %vm2749_vm8, %v1778_v29, 0.0 }
 0x374   : > { %2353 = vmatmul.mubr.msk.f32.vlgmr.msra.gmra.mrb[0].mxu1 %vm480_vm3, %v442_v21  ;;  %v1867_v36 = vpop.permute.xlu1 %1866  ;;  %v2047_v40 = vpop.permute.xlu0 %2046 }
 0x375   : > { %2355 = vmatpush1.msk.msra.mxu1 %vm484_vm2, %v1610_v22  ;;  %1685 = vmatprep.mubr.f32.mxu1 %v2531_v0  ;;  %v1870_v38 = vsel %vm1015_vm11, %v1867_v36, %v1869_v28  ;;  %v2049_v17 = vsel %vm1199_vm13, %v2047_v40, %v2823_v2  ;;  %v447_v2 = vld [vmem:[%s3069_s3 + $0x1c] sm:$0xf] }
 0x376   : > { %2357 = vmatprep.subr.msk.mxu1 %vm484_vm2, %v1333_v55  ;;  %v1874_v39 = vsel %vm2715_vm4, %v1870_v38, 0.0  ;;  %v2053_v59 = vsel %vm2737_vm7, %v2049_v17, 0.0 }
 0x378   : > { %v1959_v41 = vpop.permute.xlu1 %1958 }
 0x379   : > { %v1962_v43 = vsel %vm1110_vm12, %v1959_v41, %v1961_v37 }
 0x37c   : > { %2356 = vmatmul.mubr.msk.f32.vlgmr.msra.gmra.mrb[0].mxu1 %vm480_vm3, %v443_v34  ;;  %v2045_v45 = vpop.permute.xlu1 %2044 }
 0x37d   : > { %2358 = vmatpush1.msk.msra.mxu1 %vm484_vm2, %v2866_v54  ;;  %1765 = vmatprep.mubr.f32.mxu1 %v2531_v0  ;;  %v2048_v46 = vsel %vm1199_vm13, %v2045_v45, %v2047_v40 }
 0x37e   : > { %2360 = vmatprep.subr.msk.mxu1 %vm484_vm2, %v1783_v25  ;;  %v2052_v47 = vsel %vm2749_vm8, %v2048_v46, 0.0 }
 0x384   : > { %2359 = vmatmul.mubr.msk.f32.vlgmr.msra.gmra.mrb[0].mxu1 %vm480_vm3, %v444_v44 }
 0x385   : > { %2361 = vmatpush1.msk.msra.mxu1 %vm484_vm2, %v1782_v31  ;;  %1857 = vmatprep.mubr.f32.mxu1 %v2531_v0  ;;  %v2139_v48 = vpop.permute.xlu0 %2138 }
 0x386   : > { %2363 = vmatprep.subr.msk.mxu1 %vm484_vm2, %v1875_v35 }
 0x38c   : > { %2362 = vmatmul.mubr.msk.f32.vlgmr.msra.gmra.mrb[0].mxu1 %vm480_vm3, %v445_v49 }
 0x38d   : > { %2364 = vmatpush1.msk.msra.mxu1 %vm484_vm2, %v1874_v39  ;;  %1949 = vmatprep.mubr.f32.mxu1 %v2531_v0 }
 0x38e   : > { %2366 = vmatprep.subr.msk.mxu1 %vm484_vm2, %v1963_v20 }
 0x394   : > { %2365 = vmatmul.mubr.msk.f32.vlgmr.msra.gmra.mrb[0].mxu1 %vm480_vm3, %v446_v42 }
 0x395   : > { %2367 = vmatpush1.msk.msra.mxu1 %vm484_vm2, %v1962_v43  ;;  %2035 = vmatprep.mubr.f32.mxu1 %v2531_v0 }
 0x396   : > { %2369 = vmatprep.subr.msk.mxu1 %vm484_vm2, %v2053_v59 }
 0x39c   : > { %2368 = vmatmul.mubr.msk.f32.vlgmr.msra.gmra.mrb[0].mxu1 %vm480_vm3, %v447_v2 }
 0x39d   : > { %2370 = vmatpush1.msk.msra.mxu1 %vm484_vm2, %v2052_v47  ;;  %2127 = vmatprep.mubr.f32.mxu1 %v2531_v0  ;;  %v2144_v0 = vld [vmem:[%s398_s21] sm:$0xf]  ;;  %s2186_s21 = scalar_lea.sflag [#allocation3], %s375_s14 }
 0x3a4   : > { %2371 = vmatmul.mubr.msk.f32.vlgmr.msra.gmra.mrb[0].mxu1 %vm480_vm3, %v448_v26 }
 0x477   : > { %v2129_v50 = vpop.f32.mrb[0].mxu1 }
 0x478   : > { %v2141_v51 = vadd.f32 %v2139_v48, %v2129_v50  ;;  %v2131_v52 = vpop.f32.mrb[1].mxu1 }
 0x479   : > { %v2142_v53 = vadd.f32 %v2139_v48, %v2131_v52 }
 0x47a   : > { %v2145_v32 = vsel %vm484_vm2, %v2141_v51, 0.0 }
 0x47b   : > { %v2146_v54 = vsel %vm484_vm2, %v2142_v53, 0.0 }
 0x47c   : > { %v2147_v55 = vadd.f32 %v2146_v54, %v2145_v32 }
 0x47e   : > { %2148 = vadd.xlane.f32.xlu1 %v2147_v55 }
 0x48f   : > { %2174 = vperm.xlu1 %2461, %v2144_v0  }
 0x50b   : > { %v2149_v56 = vpop.xlane.xlu1 %2148 }
 0x50c   : > { %v2150_v57 = vmul.f32 0.00390625, %v2149_v56 }
 0x50e   : > { %v2151_v58 = vsub.f32 %v2141_v51, %v2150_v57  ;;  %v2152_v60 = vsub.f32 %v2142_v53, %v2150_v57 }
 0x50f   : > { %v2175_v15 = vpop.permute.xlu1 %2174 }
 0x510   : > { %v2153_v61 = vmul.f32 %v2151_v58, %v2151_v58  ;;  %v2154_v62 = vmul.f32 %v2152_v60, %v2152_v60 }
 0x512   : > { %v2155_v63 = vsel %vm484_vm2, %v2153_v61, 0.0  ;;  %v2156_v3 = vsel %vm484_vm2, %v2154_v62, 0.0 }
 0x513   : > { %v2157_v4 = vadd.f32 %v2156_v3, %v2155_v63 }
 0x515   : > { %2158 = vadd.xlane.f32.xlu0 %v2157_v4 }
 0x52b   : > { %2167 = vperm.xlu0 %2460, %v2143_v5  }
 0x5a2   : > { %v2159_v7 = vpop.xlane.xlu0 %2158 }
 0x5a3   : > { %v2160_v8 = vmul.f32 0.00390625, %v2159_v7 }
 0x5a5   : > { %v2161_v9 = vadd.f32 1e-05, %v2160_v8 }
 0x5a7   : > { %2465 = vrsqrt.f32 %v2161_v9 }
 0x5aa   : > { %v2168_v11 = vpop.permute.xlu0 %2167 }
 0x5b1   : > { %v2466_v6 = vpop.eup %2465 }
 0x5b2   : > { %v2163_v14 = vmul.f32 %v2466_v6, %v2151_v58  ;;  %v2164_v10 = vmul.f32 %v2466_v6, %v2152_v60 }
 0x5b4   : > { %v2170_v12 = vmul.f32 %v2168_v11, %v2163_v14  ;;  %v2171_v13 = vmul.f32 %v2168_v11, %v2164_v10 }
 0x5b6   : > { %v2177_v16 = vadd.f32 %v2175_v15, %v2170_v12  ;;  %v2178_v33 = vadd.f32 %v2175_v15, %v2171_v13 }
 0x5b8   : > { %v2181_v18 = vcombine.low %v2177_v16, %v2178_v33 }
 0x5ba   : > { %v2183_v19 = vadd.f32 %v2181_v18, %v2652_v1 }
 0x5bc   : > { %2184 = vst [vmem:[%s377_s22] sm:$0xff] %v2183_v19 }
 0x5bd   : > { %2480 = shalt.err (!%p2477_p3)
}
 0x5be   : > { %s2481_s14 = scalar_lea.hbm %s3024_s26, 128  ;;  %s2485_s22 = scalar_lea.hbm %s3075_s9, 256 }
 0x5bf   : > { %p2482_p4 = scmp.ne.s32.totalorder %s3024_s26, %s2481_s14  ;;  %p2486_p9 = scmp.lt.u32.totalorder %s3024_s26, %s3075_s9 }
 0x5c0   : > { %p2487_p10 = scmp.lt.u32.totalorder %s2485_s22, %s2481_s14  ;;  %p2489_p12 = scmp.lt.u32.totalorder %s2481_s14, %s3024_s26 }
 0x5c1   : > { %p2483_p7 = pnand %p2482_p4, %p2630_p5 }
 0x5c2   : > { %p2488_p11 = por %p2487_p10, %p2486_p9 }
 0x5c3   : > { %p2484_p8 = pneg %p2483_p7 }
 0x5c4   : > { %p2490_p13 = por %p2489_p12, %p2488_p11 }
 0x5c6   : > { %p2491_p0 = pnand %p2490_p13, %p2484_p8 }
 0x5c8   : > { %2494 = shalt.err (!%p2491_p0)
}
 0x5c9   : > { %2411 = dma.vmem_to_hbm [thread:$0]  (%p2630_p5), %s3026_s24, 128, %s3024_s26, %s2186_s21  }
 0x5ca PF: > { %p2417_p1 = scmp.ge.s32.totalorder %s2529_s12, 2  ;;  %s2212_s27 = sand.u32 1, %s2517_s30  }
 0x5cb   : > { %s2213_s13 = scalar_lea.sflag [#allocation3], %s2212_s27 }
 0x5cc   : > { %p2414_p2 = pnand %p2417_p1, %p2634_p6 }
 0x5ce   : > { %2512 = dma.done.wait (!%p2414_p2), %s2213_s13, 128  }
 0x5cf   : > { %2514 = vsyncadd (!%p2414_p2), %s2213_s13, 4294967168  ;;  %p19_p3 = scmp.ge.s32.totalorder %s2617_s15, 4   ;;  %s3092_s30 = smov %s2521_s10 }
 0x5d0   : > { %s3093_s10 = smov %s2525_s11  ;;  %s3094_s11 = smov %s2628_s18 }
 0x5d1   : > { %s3095_s12 = smov %s2617_s15  ;;  %21 = sbr.rel (!%p19_p3) target bundleno = 3 (0x3), region = 103 }
 0x5d8   :  { %2218 = vsyncpa [#allocation3], 1 }
 0x5d9   :  { %2220 = vsyncpa [#allocation3 + $0x1], 1 }

</bundles_post_ra>
